<compile_context>
chip_gen: v5e
topology: v5e:2x2
jax: 0.10.0
libtpu: 0.0.40
codegen_flags: <defaults>
</compile_context>

<pallas_src>
import functools

import jax
import jax.numpy as jnp
from jax.experimental import pallas as pl
from jax.experimental.pallas import tpu as pltpu


def _round_up(x, m):
    return (x + m - 1) // m * m


def _node_predictor_kernel(x_ref, w1_ref, b1_ref, w2_ref, b2_ref, o_ref, h_acc):
    """Grid = (row tiles, K tiles over in_dim).

    The first matmul accumulates into an f32 VMEM scratch across the K axis;
    bias + ReLU + second matmul + log_softmax run once at the last K step and
    write a lane-dense (block_rows, out_pad) output tile.
    """
    k = pl.program_id(1)

    @pl.when(k == 0)
    def _init():
        h_acc[...] = jnp.zeros_like(h_acc)

    # MXU matmul, f32 accumulate. Operands keep their input dtype.
    h_acc[...] += jnp.dot(x_ref[...], w1_ref[...],
                          preferred_element_type=jnp.float32)

    @pl.when(k == pl.num_programs(1) - 1)
    def _finalize():
        h = jnp.maximum(h_acc[...] + b1_ref[...], 0.0)        # bias + ReLU in f32
        h = h.astype(w2_ref.dtype)                            # bf16 if weights are bf16
        logits = jnp.dot(h, w2_ref[...],
                         preferred_element_type=jnp.float32) + b2_ref[...]
        # Numerically stable log_softmax. Padded output columns carry a -1e30
        # bias, so exp() of them is exactly 0 and they never win the row max.
        m = jnp.max(logits, axis=-1, keepdims=True)
        shifted = logits - m
        lse = jnp.log(jnp.sum(jnp.exp(shifted), axis=-1, keepdims=True))
        o_ref[...] = (shifted - lse).astype(o_ref.dtype)


@functools.partial(jax.jit, static_argnames=("block_rows",))
def node_predictor(node_embed, w1, b1, w2, b2, *, block_rows=None):
    """node_embed: [N, in_dim]; w1: [in_dim, hid]; b1: [hid]; w2: [hid, out]; b2: [out].

    Weights are stored [in_features, out_features]: the kernel computes
    x @ W + b (== PyTorch x @ W.T with W of shape [out, in]).
    """
    n, in_dim = node_embed.shape
    hid = w1.shape[1]
    out = w2.shape[1]

    x_bytes = jnp.dtype(node_embed.dtype).itemsize
    w_bytes = jnp.dtype(w1.dtype).itemsize

    # Lane-align the (small) weight feature dims to 128.
    hid_pad = _round_up(hid, 128)
    out_pad = _round_up(out, 128)
    in_pad = _round_up(in_dim, 128)

    b1_p = jnp.pad(b1.astype(jnp.float32), (0, hid_pad - hid)).reshape(1, hid_pad)
    w2_p = jnp.pad(w2, ((0, hid_pad - hid), (0, out_pad - out)))
    # Padded logit columns get a huge negative bias -> exp() == 0 in logsumexp.
    b2_p = jnp.pad(b2.astype(jnp.float32), (0, out_pad - out),
                   constant_values=-1e30).reshape(1, out_pad)

    # Conservative per-step VMEM budget: fits the default scoped limit on v5e
    # (16 MiB) and leaves headroom on v6e/v7x.
    budget = 12 * 1024 * 1024

    # ---- K (in_dim) handling -------------------------------------------------
    aligned = (in_dim % 128 == 0)
    full_w1_cost = 2 * in_pad * hid_pad * w_bytes  # double-buffered full-K W1 slice
    if (not aligned) and full_w1_cost <= budget // 3:
        # x stays UNPADDED (block K dim == full in_dim): no extra HBM copy of
        # the largest input. Single K step.
        x_p = node_embed
        w1_p = jnp.pad(w1, ((0, 0), (0, hid_pad - hid)))
        block_k = in_dim
        num_k = 1
    else:
        # Pad x (no-op copy when already aligned) and tile K so the W1 slice
        # never blows the VMEM budget.
        x_p = jnp.pad(node_embed, ((0, 0), (0, in_pad - in_dim)))
        w1_p = jnp.pad(w1, ((0, in_pad - in_dim), (0, hid_pad - hid)))
        block_k = in_pad
        while block_k > 128 and 2 * block_k * hid_pad * w_bytes > budget // 3:
            block_k = _round_up(block_k // 2, 128)
        num_k = pl.cdiv(in_pad, block_k)

    # ---- row tiling: pipelined, megacore-friendly, VMEM-budgeted -------------
    if block_rows is None:
        k_cost = _round_up(block_k, 128)  # VMEM tile is internally lane-padded
        fixed = (2 * k_cost * hid_pad + 2 * hid_pad * out_pad) * w_bytes \
                + 2 * (hid_pad + out_pad) * 4
        per_row = 2 * k_cost * x_bytes + 2 * out_pad * x_bytes + hid_pad * 4
        cap = max((max(budget - fixed, per_row * 8) // per_row) // 8 * 8, 8)
        block_rows = min(min(_round_up(n, 8), 512), cap)
    grid = (pl.cdiv(n, block_rows), num_k)

    cost = pl.CostEstimate(
        flops=2 * n * in_dim * hid + 2 * n * hid * out,
        transcendentals=n * out_pad + n,
        bytes_accessed=(n * in_dim * x_bytes + in_dim * hid * w_bytes
                        + hid * out * w_bytes + n * out_pad * x_bytes),
    )

    out_padded = pl.pallas_call(
        _node_predictor_kernel,
        out_shape=jax.ShapeDtypeStruct((n, out_pad), node_embed.dtype),
        grid_spec=pltpu.PrefetchScalarGridSpec(
            num_scalar_prefetch=0,
            grid=grid,
            in_specs=[
                pl.BlockSpec((block_rows, block_k), lambda i, k: (i, k)),  # x tile
                pl.BlockSpec((block_k, hid_pad), lambda i, k: (k, 0)),     # W1 K-slice
                pl.BlockSpec((1, hid_pad), lambda i, k: (0, 0)),           # b1 (resident)
                pl.BlockSpec((hid_pad, out_pad), lambda i, k: (0, 0)),     # W2 (resident)
                pl.BlockSpec((1, out_pad), lambda i, k: (0, 0)),           # b2 (resident)
            ],
            out_specs=pl.BlockSpec((block_rows, out_pad), lambda i, k: (i, 0)),
            scratch_shapes=[pltpu.VMEM((block_rows, hid_pad), jnp.float32)],
        ),
        compiler_params=pltpu.CompilerParams(
            dimension_semantics=("parallel", "arbitrary"),
        ),
        cost_estimate=cost,
    )(x_p, w1_p, b1_p, w2_p, b2_p)

    # Slice lane-padded output columns back to the real out_dim.
    return out_padded[:, :out]


def reference(node_embed, w1, b1, w2, b2):
    h = jnp.maximum(node_embed @ w1 + b1, 0.0)
    logits = h @ w2 + b2
    return jax.nn.log_softmax(logits, axis=-1)


if __name__ == "__main__":
    key = jax.random.PRNGKey(0)
    k_x, k_w1, k_b1, k_w2, k_b2 = jax.random.split(key, 5)

    # Small shapes consistent with NodePredictor(in_dim, hid_dim, out_dim)
    N, IN_DIM, HID_DIM, OUT_DIM = 16, 32, 64, 10

    node_embed = jax.random.normal(k_x, (N, IN_DIM), dtype=jnp.float32)

    # Deterministic "Kaiming-uniform-ish" init (synthetic, not a checkpoint load)
    bound1 = 1.0 / (IN_DIM ** 0.5)
    w1 = jax.random.uniform(k_w1, (IN_DIM, HID_DIM), jnp.float32, -bound1, bound1)
    b1 = jax.random.uniform(k_b1, (HID_DIM,), jnp.float32, -bound1, bound1)
    bound2 = 1.0 / (HID_DIM ** 0.5)
    w2 = jax.random.uniform(k_w2, (HID_DIM, OUT_DIM), jnp.float32, -bound2, bound2)
    b2 = jax.random.uniform(k_b2, (OUT_DIM,), jnp.float32, -bound2, bound2)

    out = node_predictor(node_embed, w1, b1, w2, b2)
    out = jax.block_until_ready(out)

    ref = reference(node_embed, w1, b1, w2, b2)
    assert out.shape == (N, OUT_DIM)
    assert jnp.allclose(out, ref, atol=1e-5, rtol=1e-5), "mismatch vs reference"

    print("KERNEL_OK")
</pallas_src>

<mosaic_0001>
module attributes {stable_mosaic.version = 11 : i64} {
  func.func @_node_predictor_kernel(%arg0: i32, %arg1: i32, %arg2: memref<16x32xf32, #tpu.memory_space<vmem>>, %arg3: memref<32x128xf32, #tpu.memory_space<vmem>>, %arg4: memref<1x128xf32, #tpu.memory_space<vmem>>, %arg5: memref<128x128xf32, #tpu.memory_space<vmem>>, %arg6: memref<1x128xf32, #tpu.memory_space<vmem>>, %arg7: memref<16x128xf32, #tpu.memory_space<vmem>>, %arg8: memref<16x128xf32, #tpu.memory_space<vmem>>) attributes {dimension_semantics = [#tpu.dimension_semantics<parallel>, #tpu.dimension_semantics<arbitrary>], iteration_bounds = array<i64: 1, 1>, scalar_prefetch = 0 : i64, scratch_operands = 1 : i64, tpu.core_type = #tpu.core_type<tc>, window_params = [{transform_indices = @transform_0, window_bounds = array<i64: 16, 32>}, {transform_indices = @transform_1, window_bounds = array<i64: 32, 128>}, {pipeline_mode = #tpu.pipeline_mode<synchronous>, transform_indices = @transform_2, window_bounds = array<i64: 1, 128>}, {pipeline_mode = #tpu.pipeline_mode<synchronous>, transform_indices = @transform_3, window_bounds = array<i64: 128, 128>}, {pipeline_mode = #tpu.pipeline_mode<synchronous>, transform_indices = @transform_4, window_bounds = array<i64: 1, 128>}, {transform_indices = @transform_5, window_bounds = array<i64: 16, 128>}]} {
    %c0_i32 = arith.constant 0 : i32
    %0 = arith.cmpi eq, %arg1, %c0_i32 : i32
    %1 = arith.extui %0 : i1 to i32
    %c0_i32_0 = arith.constant 0 : i32
    %2 = arith.cmpi ne, %1, %c0_i32_0 : i32
    scf.if %2 {
      %cst_10 = arith.constant 0.000000e+00 : f32
      %12 = vector.broadcast %cst_10 : f32 to vector<16x128xf32>
      %c0_11 = arith.constant 0 : index
      %c0_12 = arith.constant 0 : index
      %13 = vector.load %arg8[%c0_11, %c0_12] : memref<16x128xf32, #tpu.memory_space<vmem>>, vector<16x128xf32>
      tpu.vector_store %arg8[%c0_11, %c0_12], %12 {strides = array<i32>} : memref<16x128xf32, #tpu.memory_space<vmem>>, vector<16x128xf32>,
    } else {
    }
    %c0 = arith.constant 0 : index
    %c0_1 = arith.constant 0 : index
    %3 = vector.load %arg8[%c0, %c0_1] : memref<16x128xf32, #tpu.memory_space<vmem>>, vector<16x128xf32>
    %c0_2 = arith.constant 0 : index
    %c0_3 = arith.constant 0 : index
    %4 = vector.load %arg2[%c0_2, %c0_3] : memref<16x32xf32, #tpu.memory_space<vmem>>, vector<16x32xf32>
    %c0_4 = arith.constant 0 : index
    %c0_5 = arith.constant 0 : index
    %5 = vector.load %arg3[%c0_4, %c0_5] : memref<32x128xf32, #tpu.memory_space<vmem>>, vector<32x128xf32>
    %cst = arith.constant dense<0.000000e+00> : vector<16x128xf32>
    %6 = tpu.matmul %4, %5, %cst {dimension_numbers = #tpu.dot_dimension_numbers<[1], [0], [0], [1], [0, 0, 1, 1], [], []>} : vector<16x32xf32>, vector<32x128xf32>, vector<16x128xf32> -> vector<16x128xf32>
    %7 = arith.addf %3, %6 : vector<16x128xf32>
    %c0_6 = arith.constant 0 : index
    %c0_7 = arith.constant 0 : index
    %8 = vector.load %arg8[%c0_6, %c0_7] : memref<16x128xf32, #tpu.memory_space<vmem>>, vector<16x128xf32>
    tpu.vector_store %arg8[%c0_6, %c0_7], %7 {strides = array<i32>} : memref<16x128xf32, #tpu.memory_space<vmem>>, vector<16x128xf32>,
    %c0_i32_8 = arith.constant 0 : i32
    %9 = arith.cmpi eq, %arg1, %c0_i32_8 : i32
    %10 = arith.extui %9 : i1 to i32
    %c0_i32_9 = arith.constant 0 : i32
    %11 = arith.cmpi ne, %10, %c0_i32_9 : i32
    scf.if %11 {
      %c0_10 = arith.constant 0 : index
      %c0_11 = arith.constant 0 : index
      %12 = vector.load %arg8[%c0_10, %c0_11] : memref<16x128xf32, #tpu.memory_space<vmem>>, vector<16x128xf32>
      %c0_12 = arith.constant 0 : index
      %c0_13 = arith.constant 0 : index
      %13 = vector.load %arg4[%c0_12, %c0_13] : memref<1x128xf32, #tpu.memory_space<vmem>>, vector<1x128xf32>
      %14 = vector.broadcast %13 : vector<1x128xf32> to vector<16x128xf32>
      %15 = arith.addf %12, %14 : vector<16x128xf32>
      %cst_14 = arith.constant 0.000000e+00 : f32
      %16 = vector.broadcast %cst_14 : f32 to vector<16x128xf32>
      %17 = arith.maximumf %15, %16 : vector<16x128xf32>
      %c0_15 = arith.constant 0 : index
      %c0_16 = arith.constant 0 : index
      %18 = vector.load %arg5[%c0_15, %c0_16] : memref<128x128xf32, #tpu.memory_space<vmem>>, vector<128x128xf32>
      %cst_17 = arith.constant dense<0.000000e+00> : vector<16x128xf32>
      %19 = tpu.matmul %17, %18, %cst_17 {dimension_numbers = #tpu.dot_dimension_numbers<[1], [0], [0], [1], [0, 0, 1, 1], [], []>} : vector<16x128xf32>, vector<128x128xf32>, vector<16x128xf32> -> vector<16x128xf32>
      %c0_18 = arith.constant 0 : index
      %c0_19 = arith.constant 0 : index
      %20 = vector.load %arg6[%c0_18, %c0_19] : memref<1x128xf32, #tpu.memory_space<vmem>>, vector<1x128xf32>
      %21 = vector.broadcast %20 : vector<1x128xf32> to vector<16x128xf32>
      %22 = arith.addf %19, %21 : vector<16x128xf32>
      %cst_20 = arith.constant dense<0xFF800000> : vector<16xf32>
      %23 = vector.multi_reduction <maximumf>, %22, %cst_20 [1] : vector<16x128xf32> to vector<16xf32>
      %24 = vector.shape_cast %23 : vector<16xf32> to vector<16x1xf32>
      %25 = vector.broadcast %24 : vector<16x1xf32> to vector<16x128xf32>
      %26 = arith.subf %22, %25 : vector<16x128xf32>
      %27 = math.exp %26 : vector<16x128xf32>
      %cst_21 = arith.constant dense<0.000000e+00> : vector<16xf32>
      %28 = vector.multi_reduction <add>, %27, %cst_21 [1] : vector<16x128xf32> to vector<16xf32>
      %29 = vector.shape_cast %28 : vector<16xf32> to vector<16x1xf32>
      %30 = math.log %29 : vector<16x1xf32>
      %31 = vector.broadcast %30 : vector<16x1xf32> to vector<16x128xf32>
      %32 = arith.subf %26, %31 : vector<16x128xf32>
      %c0_22 = arith.constant 0 : index
      %c0_23 = arith.constant 0 : index
      %33 = vector.load %arg7[%c0_22, %c0_23] : memref<16x128xf32, #tpu.memory_space<vmem>>, vector<16x128xf32>
      tpu.vector_store %arg7[%c0_22, %c0_23], %32 {strides = array<i32>} : memref<16x128xf32, #tpu.memory_space<vmem>>, vector<16x128xf32>,
    } else {
    }
    return
  }
  func.func @transform_0(%arg0: i32, %arg1: i32) -> (i32, i32) {
    %c0_i32 = arith.constant 0 : i32
    return %arg0, %arg1 : i32, i32
  }
  func.func @transform_1(%arg0: i32, %arg1: i32) -> (i32, i32) {
    %c0_i32 = arith.constant 0 : i32
    %c0_i32_0 = arith.constant 0 : i32
    return %arg1, %c0_i32 : i32, i32
  }
  func.func @transform_2(%arg0: i32, %arg1: i32) -> (i32, i32) {
    %c0_i32 = arith.constant 0 : i32
    %c0_i32_0 = arith.constant 0 : i32
    %c0_i32_1 = arith.constant 0 : i32
    return %c0_i32, %c0_i32_0 : i32, i32
  }
  func.func @transform_3(%arg0: i32, %arg1: i32) -> (i32, i32) {
    %c0_i32 = arith.constant 0 : i32
    %c0_i32_0 = arith.constant 0 : i32
    %c0_i32_1 = arith.constant 0 : i32
    return %c0_i32, %c0_i32_0 : i32, i32
  }
  func.func @transform_4(%arg0: i32, %arg1: i32) -> (i32, i32) {
    %c0_i32 = arith.constant 0 : i32
    %c0_i32_0 = arith.constant 0 : i32
    %c0_i32_1 = arith.constant 0 : i32
    return %c0_i32, %c0_i32_0 : i32, i32
  }
  func.func @transform_5(%arg0: i32, %arg1: i32) -> (i32, i32) {
    %c0_i32 = arith.constant 0 : i32
    %c0_i32_0 = arith.constant 0 : i32
    return %arg0, %c0_i32 : i32, i32
  }
}

</mosaic_0001>

<bundles_post_ra>
// kernel: node_predictor.1
= control target key start
LH: loop header
LB: loop body
LE: loop exit
PB: predicated region body
PF: predicated region fallthrough
CT: control target
= control target key end

     0   :  { %vm35_vm0 = vcmask 261120   ;;  %s332_s0 = inlined_call_operand.vmem [shape: f32[16,32], index: 0, kind: input, shape index: {}]   ;;  %s333_s1 = inlined_call_operand.vmem [shape: f32[32,128], index: 1, kind: input, shape index: {}]   ;;  %s334_s2 = inlined_call_operand.vmem [shape: f32[1,128], index: 2, kind: input, shape index: {}]   ;;  %s335_s3 = inlined_call_operand.vmem [shape: f32[128,128], index: 3, kind: input, shape index: {}]   ;;  %s336_s4 = inlined_call_operand.vmem [shape: f32[1,128], index: 4, kind: input, shape index: {}]   ;;  %s337_s5 = inlined_call_operand.hbm [shape: f32[16,128], index: 5, kind: output, shape index: {}]  }
   0x1   :  { %v34_v0 = vld [vmem:[%s333_s1 + $0x18] sm:$0xff]  ;;  %v33_v1 = vld [vmem:[%s333_s1 + $0x10] sm:$0xff]  ;;  %v32_v2 = vld [vmem:[%s333_s1 + $0x8] sm:$0xff] }
   0x2   :  { %54 = vmatpush.msra.mxu0 %v34_v0  ;;  %v97_v3 = vld [vmem:[%s335_s3 + $0x78] sm:$0xff]  ;;  %v96_v4 = vld [vmem:[%s335_s3 + $0x70] sm:$0xff]  ;;  %v31_v5 = vld [vmem:[%s333_s1] sm:$0xff] }
   0x3   :  { %102 = vmatpush.msra.mxu1 %v97_v3  ;;  %v95_v6 = vld [vmem:[%s335_s3 + $0x68] sm:$0xff]  ;;  %167 = vmatpush.msra.mxu2 %v97_v3  ;;  %v29_v7 = vld [vmem:[%s332_s0] sm:$0xff] }
   0x4   :  { %55 = vmatpush.msra.mxu0 %v33_v1  ;;  %v94_v8 = vld [vmem:[%s335_s3 + $0x60] sm:$0xff] }
   0x5   :  { %103 = vmatpush.msra.mxu1 %v96_v4  ;;  %168 = vmatpush.msra.mxu2 %v96_v4 }
   0x6   :  { %56 = vmatpush.msra.mxu0 %v32_v2 }
   0x7   :  { %104 = vmatpush.msra.mxu1 %v95_v6 }
   0x8   :  { %57 = vmatpush.msra.mxu0 %v31_v5 }
   0x9   :  { %10 = vsyncpa [#allocation4], 0  ;;  %165 = vmatmul.msk.f32.vlgmr.msra.gmra.mxu0 %vm35_vm0, %v29_v7  ;;  %v93_v9 = vld [vmem:[%s335_s3 + $0x58] sm:$0xff]  ;;  %169 = vmatpush.msra.mxu2 %v95_v6  ;;  %v92_v10 = vld [vmem:[%s335_s3 + $0x50] sm:$0xff]  ;;  %s153_s14 = sshll.u32 %s337_s5, 4  ;;  %s223_s15 = smov 128   ;;  %s154_s14 = int_to_ptr.hbm [resolvable:$true] %s153_s14 }
   0xa   :  { %105 = vmatpush.msra.mxu1 %v94_v8  ;;  %v91_v11 = vld [vmem:[%s335_s3 + $0x48] sm:$0xff]  ;;  %v90_v13 = vld [vmem:[%s335_s3 + $0x40] sm:$0xff]  ;;  %v89_v14 = vld [vmem:[%s335_s3 + $0x38] sm:$0xff]  ;;  %s224_s16 = smov 8  }
   0xb   :  { %170 = vmatpush.msra.mxu2 %v94_v8  ;;  %v30_v12 = vld [vmem:[%s332_s0 + $0x8] sm:$0xff]  ;;  %v88_v15 = vld [vmem:[%s335_s3 + $0x30] sm:$0xff]  ;;  %v86_v17 = vld [vmem:[%s335_s3 + $0x20] sm:$0xff] }
   0xc   :  { %106 = vmatpush.msra.mxu1 %v93_v9  ;;  %v87_v16 = vld [vmem:[%s335_s3 + $0x28] sm:$0xff]  ;;  %v85_v18 = vld [vmem:[%s335_s3 + $0x18] sm:$0xff]  ;;  %v84_v19 = vld [vmem:[%s335_s3 + $0x10] sm:$0xff] }
   0xd   :  { %171 = vmatpush.msra.mxu2 %v93_v9  ;;  %v83_v20 = vld [vmem:[%s335_s3 + $0x8] sm:$0xff]  ;;  %v82_v21 = vld [vmem:[%s335_s3] sm:$0xff] }
   0xe   :  { %107 = vmatpush.msra.mxu1 %v92_v10  ;;  %v186_v22 = vld [vmem:[%s334_s2] ss:$0 sm:$0xff]  ;;  %s222_s2 = smov [#allocation3]  }
   0xf   :  { %172 = vmatpush.msra.mxu2 %v92_v10  ;;  %v187_v29 = vld [vmem:[%s336_s4] ss:$0 sm:$0xff]  ;;  %s151_s3 = sshll.u32 %s222_s2, 4  ;;  %s152_s3 = int_to_ptr.vmem [resolvable:$true] %s151_s3 }
  0x10   :  { %108 = vmatpush.msra.mxu1 %v91_v11 }
  0x11   :  { %166 = vmatmul.msk.f32.gmra.mxu0 %vm35_vm0, %v30_v12  ;;  %173 = vmatpush.msra.mxu2 %v91_v11 }
  0x12   :  { %109 = vmatpush.msra.mxu1 %v90_v13 }
  0x13   :  { %174 = vmatpush.msra.mxu2 %v90_v13 }
  0x14   :  { %110 = vmatpush.msra.mxu1 %v89_v14 }
  0x15   :  { %175 = vmatpush.msra.mxu2 %v89_v14 }
  0x16   :  { %111 = vmatpush.msra.mxu1 %v88_v15 }
  0x17   :  { %176 = vmatpush.msra.mxu2 %v88_v15 }
  0x18   :  { %112 = vmatpush.msra.mxu1 %v87_v16 }
  0x19   :  { %177 = vmatpush.msra.mxu2 %v87_v16 }
  0x1a   :  { %113 = vmatpush.msra.mxu1 %v86_v17 }
  0x1b   :  { %178 = vmatpush.msra.mxu2 %v86_v17 }
  0x1c   :  { %114 = vmatpush.msra.mxu1 %v85_v18 }
  0x1d   :  { %179 = vmatpush.msra.mxu2 %v85_v18 }
  0x1e   :  { %115 = vmatpush.msra.mxu1 %v84_v19 }
  0x1f   :  { %180 = vmatpush.msra.mxu2 %v84_v19 }
  0x20   :  { %116 = vmatpush.msra.mxu1 %v83_v20 }
  0x21   :  { %181 = vmatpush.msra.mxu2 %v83_v20 }
  0x22   :  { %117 = vmatpush.msra.mxu1 %v82_v21 }
  0x23   :  { %182 = vmatpush.msra.mxu2 %v82_v21 }
  0x86   :  { %v59_v23 = vpop.f32.mrf.mxu0 }
  0x87   :  { %v78_v24 = vadd.f32 %v186_v22, %v59_v23 }
  0x89   :  { %v80_v25 = vmax.f32 %v78_v24, 0.0 }
  0x8b   :  { %118 = vmatmul.f32.vlgmr.msra.gmra.mxu1 %v80_v25 }
  0x8e   :  { %v62_v26 = vpop.f32.mrf.mxu0 }
  0x8f   :  { %v79_v27 = vadd.f32 %v186_v22, %v62_v26 }
  0x91   :  { %v81_v28 = vmax.f32 %v79_v27, 0.0 }
  0x93   :  { %121 = vmatmul.f32.vlgmr.msra.gmra.mxu2 %v81_v28 }
 0x108   :  { %v119_v30 = vpop.f32.mrf.mxu1 }
 0x109   :  { %v120_v31 = vadd.f32 %v187_v29, %v119_v30 }
 0x10b   :  { %125 = vmax.xlane.f32.xlu0 %v120_v31 }
 0x116   :  { %v122_v32 = vpop.f32.mrf.mxu2 }
 0x117   :  { %v123_v33 = vadd.f32 %v187_v29, %v122_v32 }
 0x119   :  { %127 = vmax.xlane.f32.xlu0 %v123_v33 }
 0x17e   :  { %v126_v34 = vpop.xlane.xlu0 %125 }
 0x17f   :  { %v129_v35 = vsub.f32 %v120_v31, %v126_v34 }
 0x181   :  { %v131_v36 = vmul.f32 1.442695, %v129_v35 }
 0x183   :  { %188 = vpow2.f32 %v131_v36 }
 0x189   :  { %v189_v37 = vpop.eup %188 }
 0x18a   :  { %135 = vadd.xlane.f32.xlu1 %v189_v37 }
 0x18c   :  { %v128_v38 = vpop.xlane.xlu0 %127 }
 0x18d   :  { %v130_v39 = vsub.f32 %v123_v33, %v128_v38 }
 0x18f   :  { %v133_v40 = vmul.f32 1.442695, %v130_v39 }
 0x191   :  { %190 = vpow2.f32 %v133_v40 }
 0x197   :  { %v191_v41 = vpop.eup %190 }
 0x198   :  { %137 = vadd.xlane.f32.xlu1 %v191_v41 }
 0x1fd   :  { %v136_v42 = vpop.xlane.xlu1 %135 }
 0x1fe   :  { %192 = vlog2.f32 %v136_v42 }
 0x204   :  { %v193_v43 = vpop.eup %192 }
 0x205   :  { %v140_v44 = vmul.f32 0.6931472, %v193_v43 }
 0x207   :  { %v143_v45 = vsub.f32 %v129_v35, %v140_v44 }
 0x209   :  { %145 = vst [vmem:[#allocation3] sm:$0xff] %v143_v45 }
 0x20b   :  { %v138_v46 = vpop.xlane.xlu1 %137 }
 0x20c   :  { %194 = vlog2.f32 %v138_v46 }
 0x212   :  { %v195_v47 = vpop.eup %194 }
 0x213   :  { %v142_v48 = vmul.f32 0.6931472, %v195_v47 }
 0x215   :  { %v144_v49 = vsub.f32 %v130_v39, %v142_v48 }
 0x217   :  { %146 = vst [vmem:[#allocation3 + $0x8] sm:$0xff] %v144_v49 }
 0x218   :  { %159 = dma.vmem_to_hbm [thread:$0]  %s152_s3, 256, %s154_s14, [#allocation4], %s223_s15, %s223_s15, %s224_s16  }
 0x219   :  { %220 = dma.done.wait [#allocation4], 256  }
 0x21a   :  { %221 = vsyncadd [#allocation4], 4294967040 }
 0x21b   :  { %164 = vsyncpa [#allocation4], 1 }

</bundles_post_ra>
